<compile_context>
chip_gen: v6e
topology: v6e:2x2x1
jax: 0.10.0
libtpu: 0.0.40
codegen_flags: <defaults>
</compile_context>

<pallas_src>
import functools

import jax
import jax.numpy as jnp
from jax.experimental import pallas as pl
from jax.experimental.pallas import tpu as pltpu


def _round_up(x: int, m: int) -> int:
    return (x + m - 1) // m * m


def _lipswish(x):
    # 0.909 * silu(x) = 0.909 * x * sigmoid(x)   (f32 math; sigmoid goes to the EUP)
    return 0.909 * x * jax.nn.sigmoid(x)


# --------------------------------------------------------------------------------------
# Kernel
# --------------------------------------------------------------------------------------
def mlp_kernel(x_ref, w1_ref, b1_ref, w2_ref, b2_ref, w3_ref, b3_ref, o_ref,
               *, use_tanh: bool, packed: bool):
    # All math in f32.  NOTE: default MXU precision is plenty at K=16/32 (verified vs. the
    # f32 reference at 1e-5); pass precision=lax.Precision.HIGHEST in the dots if exact f32
    # accumulation is needed at much larger hidden sizes.
    h = jnp.dot(x_ref[...], w1_ref[...], preferred_element_type=jnp.float32)
    h = _lipswish(h + b1_ref[...])

    h = jnp.dot(h, w2_ref[...], preferred_element_type=jnp.float32)
    h = _lipswish(h + b2_ref[...])

    y = jnp.dot(h, w3_ref[...], preferred_element_type=jnp.float32)

    if packed:
        # Fold groups of (128 // out_sz) batch rows into one 128-wide lane row so the
        # bias-add + tanh below run on dense vregs and the store is a full, unmasked vst.
        y = y.reshape(o_ref.shape)

    # b3 is already laid out to match the store layout (prepare_params), so this is dense.
    y = y + b3_ref[...]
    if use_tanh:
        y = jnp.tanh(y)
    o_ref[...] = y


# --------------------------------------------------------------------------------------
# One-time capability probe for the lane-packed store (falls back to a plain store).
# --------------------------------------------------------------------------------------
_PACKED_STORE_OK = None


def _packed_store_supported() -> bool:
    """Checks (once) that Mosaic lowers the in-kernel (rows, out)->(rows*out//128, 128)
    fold used by the lane-packed output path, and that it preserves row-major order."""
    global _PACKED_STORE_OK
    if _PACKED_STORE_OK is None:
        def _fold(x_ref, o_ref):
            o_ref[...] = x_ref[...].reshape(o_ref.shape)

        try:
            x = jnp.arange(128 * 8, dtype=jnp.float32).reshape(128, 8)
            out = pl.pallas_call(
                _fold, out_shape=jax.ShapeDtypeStruct((8, 128), jnp.float32))(x)
            _PACKED_STORE_OK = bool(jnp.array_equal(out, x.reshape(8, 128)))
        except Exception:
            _PACKED_STORE_OK = False
    return _PACKED_STORE_OK


# --------------------------------------------------------------------------------------
# Tiling policy
# --------------------------------------------------------------------------------------
# Per-step VMEM at tile_m=2048 is ~5 MiB (x tile, hidden activations, packed output, all
# (8,128)-tile padded), which fits v5e's 16 MiB default scoped VMEM with headroom and is
# far under v6e/v7x limits.  Raise together with CompilerParams(vmem_limit_bytes=...) if
# you want even fewer grid steps for very large batches.
_MAX_TILE_M = 2048


def _choose_tile_m(batch: int, g_m: int, requested=None) -> int:
    if requested is not None:
        t = _round_up(max(int(requested), g_m), g_m)
    else:
        # Aim for ~2 grid steps so dimension_semantics=("parallel",) keeps both v7x
        # TensorCores busy, while amortizing the ~0.35us fixed per-step overhead.
        t = min(_round_up(pl.cdiv(batch, 2), g_m), _round_up(_MAX_TILE_M, g_m))
    t = max(g_m, min(t, _round_up(batch, g_m)))
    # Prefer an even number of steps (v7x megacore balance); best effort only.
    n = pl.cdiv(batch, t)
    if n > 2 and n % 2 == 1:
        t = max(g_m, _round_up(pl.cdiv(batch, n + 1), g_m))
    return t


# --------------------------------------------------------------------------------------
# Forward wrapper
# --------------------------------------------------------------------------------------
def mlp_forward(x, params, *, use_tanh=True, tile_m=None):
    """Fused MLP forward.  x: (B, input_size) f32.  params: output of prepare_params()
    (one-time layout prep; nothing is padded or cast per call)."""
    B, in_sz = x.shape
    w1, b1 = params["w1"], params["b1"]
    w2, b2 = params["w2"], params["b2"]
    w3, b3 = params["w3"], params["b3"]
    hid = w1.shape[1]
    out_sz = w3.shape[1]

    # Lane-packed output path: fold G = 128 // out_sz batch rows per 128-wide output row.
    packed = ("b3_packed" in params) and _packed_store_supported()

    # Tile granularity: packed output blocks must be whole (8, 128) vreg tiles after the
    # fold (tile_m * out_sz % 1024 == 0); otherwise just keep tile_m a multiple of 8.
    g_m = (1024 // out_sz) if packed else 8
    tile_m = _choose_tile_m(B, g_m, tile_m)
    n_steps = pl.cdiv(B, tile_m)

    # Only tiny batches (B < one tile) get padded; larger batches rely on Pallas' masked
    # boundary block instead of an extra pad/copy pass over x (review item 4).
    if tile_m > B:
        x = jnp.pad(x, ((0, tile_m - B), (0, 0)))

    if packed:
        pk_rows = tile_m * out_sz // 128
        out_rows = max(pl.cdiv(B * out_sz, 128), pk_rows)
        out_cols = 128
        out_spec = pl.BlockSpec((pk_rows, out_cols), lambda i: (i, 0))
        b3_in = params["b3_packed"]
    else:
        out_rows = max(B, tile_m)
        out_cols = out_sz
        out_spec = pl.BlockSpec((tile_m, out_cols), lambda i: (i, 0))
        b3_in = b3

    full = lambda shape: pl.BlockSpec(shape, lambda i: (0, 0))  # weights stay resident

    flops = 2 * n_steps * tile_m * (in_sz * hid + hid * hid + hid * out_sz)
    transcendentals = n_steps * tile_m * (2 * hid + (out_sz if use_tanh else 0))
    bytes_accessed = (x.size * x.dtype.itemsize
                      + sum(int(a.size) * a.dtype.itemsize
                            for a in (w1, b1, w2, b2, w3, b3_in))
                      + out_rows * out_cols * 4)

    y = pl.pallas_call(
        functools.partial(mlp_kernel, use_tanh=use_tanh, packed=packed),
        out_shape=jax.ShapeDtypeStruct((out_rows, out_cols), jnp.float32),
        grid=(n_steps,),
        in_specs=[
            pl.BlockSpec((tile_m, in_sz), lambda i: (i, 0)),  # x tile (batch-parallel)
            full((in_sz, hid)), full((1, hid)),               # layer 1
            full((hid, hid)), full((1, hid)),                 # layer 2
            full((hid, out_sz)), full((1, out_cols)),         # output layer
        ],
        out_specs=out_spec,
        compiler_params=pltpu.CompilerParams(
            dimension_semantics=("parallel",)),
        cost_estimate=pl.CostEstimate(
            flops=flops,
            transcendentals=transcendentals,
            bytes_accessed=bytes_accessed),
    )(x, w1, b1, w2, b2, w3, b3_in)

    if packed:
        y = y.reshape(-1, out_sz)   # contiguous row-major unpack of the packed rows
    if y.shape[0] != B:
        y = y[:B]                   # drop boundary-tile rows (tiny, true-size slice)
    return y


# --------------------------------------------------------------------------------------
# Parameters
# --------------------------------------------------------------------------------------
def init_params(key, input_size, hidden_size, output_size):
    """Deterministic torch-like init: U(-1/sqrt(fan_in), 1/sqrt(fan_in)).
    Weights are stored transposed relative to torch, i.e. (in, out)."""
    def linear(k, fan_in, fan_out):
        kw, kb = jax.random.split(k)
        bound = 1.0 / jnp.sqrt(fan_in)
        w = jax.random.uniform(kw, (fan_in, fan_out), jnp.float32, -bound, bound)
        b = jax.random.uniform(kb, (1, fan_out), jnp.float32, -bound, bound)
        return w, b

    k1, k2, k3 = jax.random.split(key, 3)
    w1, b1 = linear(k1, input_size, hidden_size)
    w2, b2 = linear(k2, hidden_size, hidden_size)
    w3, b3 = linear(k3, hidden_size, output_size)
    return {"w1": w1, "b1": b1, "w2": w2, "b2": b2, "w3": w3, "b3": b3}


def prepare_params(params):
    """One-time, out-of-the-hot-path parameter prep (review item 3):
    * weights as (in, out) f32, biases as (1, out) f32,
    * b3 pre-tiled to the packed 128-lane store layout when out_sz divides 128."""
    def as2d(b):
        return jnp.asarray(b, jnp.float32).reshape(1, -1)

    p = {
        "w1": jnp.asarray(params["w1"], jnp.float32), "b1": as2d(params["b1"]),
        "w2": jnp.asarray(params["w2"], jnp.float32), "b2": as2d(params["b2"]),
        "w3": jnp.asarray(params["w3"], jnp.float32), "b3": as2d(params["b3"]),
    }
    out_sz = p["w3"].shape[1]
    if out_sz < 128 and 128 % out_sz == 0:
        p["b3_packed"] = jnp.tile(p["b3"], (1, 128 // out_sz))   # (1, 128)
    return p


def mlp_reference(x, params, use_tanh=True):
    h = x @ params["w1"] + params["b1"]
    h = 0.909 * h * jax.nn.sigmoid(h)
    h = h @ params["w2"] + params["b2"]
    h = 0.909 * h * jax.nn.sigmoid(h)
    y = h @ params["w3"] + params["b3"]
    return jnp.tanh(y) if use_tanh else y


if __name__ == "__main__":
    # MLP(input_size=16, output_size=8, hidden_size=32, num_layers=2, use_tanh=True)
    input_size, hidden_size, output_size = 16, 32, 8
    use_tanh = True

    key = jax.random.PRNGKey(0)
    kx1, kx2, kp = jax.random.split(key, 3)
    params = prepare_params(init_params(kp, input_size, hidden_size, output_size))

    fwd = jax.jit(functools.partial(mlp_forward, use_tanh=use_tanh))

    # Small, non-multiple-of-8 batch: single tile, packed store masked to the true rows.
    x_small = jax.random.normal(kx1, (12, input_size), jnp.float32)
    out_small = jax.block_until_ready(fwd(x_small, params))
    ref_small = mlp_reference(x_small, params, use_tanh=use_tanh)
    assert out_small.shape == (12, output_size)
    assert jnp.allclose(out_small, ref_small, atol=1e-5, rtol=1e-5), "small-batch mismatch"

    # Larger batch: two 512-row tiles (both v7x TensorCores get work), partial boundary
    # tile handled by Pallas masking (no batch pad, no full-array post slice).
    x_big = jax.random.normal(kx2, (1000, input_size), jnp.float32)
    out_big = jax.block_until_ready(fwd(x_big, params))
    ref_big = mlp_reference(x_big, params, use_tanh=use_tanh)
    assert out_big.shape == (1000, output_size)
    assert jnp.allclose(out_big, ref_big, atol=1e-5, rtol=1e-5), "big-batch mismatch"

    print("KERNEL_OK")
</pallas_src>

<mosaic_0001>
module attributes {stable_mosaic.version = 11 : i64} {
  func.func @mlp_kernel(%arg0: i32, %arg1: memref<8x16xf32, #tpu.memory_space<vmem>>, %arg2: memref<16x32xf32, #tpu.memory_space<vmem>>, %arg3: memref<1x32xf32, #tpu.memory_space<vmem>>, %arg4: memref<32x32xf32, #tpu.memory_space<vmem>>, %arg5: memref<1x32xf32, #tpu.memory_space<vmem>>, %arg6: memref<32x8xf32, #tpu.memory_space<vmem>>, %arg7: memref<1x8xf32, #tpu.memory_space<vmem>>, %arg8: memref<8x8xf32, #tpu.memory_space<vmem>>) attributes {dimension_semantics = [#tpu.dimension_semantics<parallel>], iteration_bounds = array<i64: 2>, scalar_prefetch = 0 : i64, scratch_operands = 0 : i64, tpu.core_type = #tpu.core_type<tc>, window_params = [{transform_indices = @transform_0, window_bounds = array<i64: 8, 16>}, {pipeline_mode = #tpu.pipeline_mode<synchronous>, transform_indices = @transform_1, window_bounds = array<i64: 16, 32>}, {pipeline_mode = #tpu.pipeline_mode<synchronous>, transform_indices = @transform_2, window_bounds = array<i64: 1, 32>}, {pipeline_mode = #tpu.pipeline_mode<synchronous>, transform_indices = @transform_3, window_bounds = array<i64: 32, 32>}, {pipeline_mode = #tpu.pipeline_mode<synchronous>, transform_indices = @transform_4, window_bounds = array<i64: 1, 32>}, {pipeline_mode = #tpu.pipeline_mode<synchronous>, transform_indices = @transform_5, window_bounds = array<i64: 32, 8>}, {pipeline_mode = #tpu.pipeline_mode<synchronous>, transform_indices = @transform_6, window_bounds = array<i64: 1, 8>}, {transform_indices = @transform_7, window_bounds = array<i64: 8, 8>}]} {
    %c0 = arith.constant 0 : index
    %c0_0 = arith.constant 0 : index
    %0 = vector.load %arg1[%c0, %c0_0] : memref<8x16xf32, #tpu.memory_space<vmem>>, vector<8x16xf32>
    %c0_1 = arith.constant 0 : index
    %c0_2 = arith.constant 0 : index
    %1 = vector.load %arg2[%c0_1, %c0_2] : memref<16x32xf32, #tpu.memory_space<vmem>>, vector<16x32xf32>
    %cst = arith.constant dense<0.000000e+00> : vector<8x32xf32>
    %2 = tpu.matmul %0, %1, %cst {dimension_numbers = #tpu.dot_dimension_numbers<[1], [0], [0], [1], [0, 0, 1, 1], [], []>} : vector<8x16xf32>, vector<16x32xf32>, vector<8x32xf32> -> vector<8x32xf32>
    %c0_3 = arith.constant 0 : index
    %c0_4 = arith.constant 0 : index
    %3 = vector.load %arg3[%c0_3, %c0_4] : memref<1x32xf32, #tpu.memory_space<vmem>>, vector<1x32xf32>
    %4 = vector.broadcast %3 : vector<1x32xf32> to vector<8x32xf32>
    %5 = arith.addf %2, %4 : vector<8x32xf32>
    %cst_5 = arith.constant 0.908999979 : f32
    %6 = vector.broadcast %cst_5 : f32 to vector<8x32xf32>
    %7 = arith.mulf %6, %5 : vector<8x32xf32>
    %8 = arith.negf %5 : vector<8x32xf32>
    %9 = math.exp %8 : vector<8x32xf32>
    %cst_6 = arith.constant 1.000000e+00 : f32
    %10 = vector.broadcast %cst_6 : f32 to vector<8x32xf32>
    %11 = arith.addf %10, %9 : vector<8x32xf32>
    %12 = arith.divf %10, %11 : vector<8x32xf32>
    %13 = arith.mulf %7, %12 : vector<8x32xf32>
    %c0_7 = arith.constant 0 : index
    %c0_8 = arith.constant 0 : index
    %14 = vector.load %arg4[%c0_7, %c0_8] : memref<32x32xf32, #tpu.memory_space<vmem>>, vector<32x32xf32>
    %cst_9 = arith.constant dense<0.000000e+00> : vector<8x32xf32>
    %15 = tpu.matmul %13, %14, %cst_9 {dimension_numbers = #tpu.dot_dimension_numbers<[1], [0], [0], [1], [0, 0, 1, 1], [], []>} : vector<8x32xf32>, vector<32x32xf32>, vector<8x32xf32> -> vector<8x32xf32>
    %c0_10 = arith.constant 0 : index
    %c0_11 = arith.constant 0 : index
    %16 = vector.load %arg5[%c0_10, %c0_11] : memref<1x32xf32, #tpu.memory_space<vmem>>, vector<1x32xf32>
    %17 = vector.broadcast %16 : vector<1x32xf32> to vector<8x32xf32>
    %18 = arith.addf %15, %17 : vector<8x32xf32>
    %cst_12 = arith.constant 0.908999979 : f32
    %19 = vector.broadcast %cst_12 : f32 to vector<8x32xf32>
    %20 = arith.mulf %19, %18 : vector<8x32xf32>
    %21 = arith.negf %18 : vector<8x32xf32>
    %22 = math.exp %21 : vector<8x32xf32>
    %cst_13 = arith.constant 1.000000e+00 : f32
    %23 = vector.broadcast %cst_13 : f32 to vector<8x32xf32>
    %24 = arith.addf %23, %22 : vector<8x32xf32>
    %25 = arith.divf %23, %24 : vector<8x32xf32>
    %26 = arith.mulf %20, %25 : vector<8x32xf32>
    %c0_14 = arith.constant 0 : index
    %c0_15 = arith.constant 0 : index
    %27 = vector.load %arg6[%c0_14, %c0_15] : memref<32x8xf32, #tpu.memory_space<vmem>>, vector<32x8xf32>
    %cst_16 = arith.constant dense<0.000000e+00> : vector<8x8xf32>
    %28 = tpu.matmul %26, %27, %cst_16 {dimension_numbers = #tpu.dot_dimension_numbers<[1], [0], [0], [1], [0, 0, 1, 1], [], []>} : vector<8x32xf32>, vector<32x8xf32>, vector<8x8xf32> -> vector<8x8xf32>
    %c0_17 = arith.constant 0 : index
    %c0_18 = arith.constant 0 : index
    %29 = vector.load %arg7[%c0_17, %c0_18] : memref<1x8xf32, #tpu.memory_space<vmem>>, vector<1x8xf32>
    %30 = vector.broadcast %29 : vector<1x8xf32> to vector<8x8xf32>
    %31 = arith.addf %28, %30 : vector<8x8xf32>
    %32 = math.tanh %31 : vector<8x8xf32>
    %c0_19 = arith.constant 0 : index
    %c0_20 = arith.constant 0 : index
    %33 = vector.load %arg8[%c0_19, %c0_20] : memref<8x8xf32, #tpu.memory_space<vmem>>, vector<8x8xf32>
    tpu.vector_store %arg8[%c0_19, %c0_20], %32 {strides = array<i32>} : memref<8x8xf32, #tpu.memory_space<vmem>>, vector<8x8xf32>,
    return
  }
  func.func @transform_0(%arg0: i32) -> (i32, i32) {
    %c0_i32 = arith.constant 0 : i32
    %c0_i32_0 = arith.constant 0 : i32
    return %arg0, %c0_i32 : i32, i32
  }
  func.func @transform_1(%arg0: i32) -> (i32, i32) {
    %c0_i32 = arith.constant 0 : i32
    %c0_i32_0 = arith.constant 0 : i32
    %c0_i32_1 = arith.constant 0 : i32
    return %c0_i32, %c0_i32_0 : i32, i32
  }
  func.func @transform_2(%arg0: i32) -> (i32, i32) {
    %c0_i32 = arith.constant 0 : i32
    %c0_i32_0 = arith.constant 0 : i32
    %c0_i32_1 = arith.constant 0 : i32
    return %c0_i32, %c0_i32_0 : i32, i32
  }
  func.func @transform_3(%arg0: i32) -> (i32, i32) {
    %c0_i32 = arith.constant 0 : i32
    %c0_i32_0 = arith.constant 0 : i32
    %c0_i32_1 = arith.constant 0 : i32
    return %c0_i32, %c0_i32_0 : i32, i32
  }
  func.func @transform_4(%arg0: i32) -> (i32, i32) {
    %c0_i32 = arith.constant 0 : i32
    %c0_i32_0 = arith.constant 0 : i32
    %c0_i32_1 = arith.constant 0 : i32
    return %c0_i32, %c0_i32_0 : i32, i32
  }
  func.func @transform_5(%arg0: i32) -> (i32, i32) {
    %c0_i32 = arith.constant 0 : i32
    %c0_i32_0 = arith.constant 0 : i32
    %c0_i32_1 = arith.constant 0 : i32
    return %c0_i32, %c0_i32_0 : i32, i32
  }
  func.func @transform_6(%arg0: i32) -> (i32, i32) {
    %c0_i32 = arith.constant 0 : i32
    %c0_i32_0 = arith.constant 0 : i32
    %c0_i32_1 = arith.constant 0 : i32
    return %c0_i32, %c0_i32_0 : i32, i32
  }
  func.func @transform_7(%arg0: i32) -> (i32, i32) {
    %c0_i32 = arith.constant 0 : i32
    %c0_i32_0 = arith.constant 0 : i32
    return %arg0, %c0_i32 : i32, i32
  }
}

</mosaic_0001>

<bundles_post_ra>
// kernel: mlp_forward.1
= control target key start
LH: loop header
LB: loop body
LE: loop exit
PB: predicated region body
PF: predicated region fallthrough
CT: control target
= control target key end

     0   :  { %12 = vsyncpa [#allocation3], 0  ;;  %s1046_s0 = inlined_call_operand.vmem [shape: f32[12,16], index: 0, kind: input, shape index: {}]   ;;  %s1047_s1 = inlined_call_operand.hbm [shape: f32[16,32], index: 1, kind: input, shape index: {}]   ;;  %s1048_s2 = inlined_call_operand.vmem [shape: f32[1,32], index: 2, kind: input, shape index: {}]   ;;  %s1049_s3 = inlined_call_operand.vmem [shape: f32[32,32], index: 3, kind: input, shape index: {}]   ;;  %s1050_s4 = inlined_call_operand.hbm [shape: f32[1,32], index: 4, kind: input, shape index: {}]   ;;  %s1051_s5 = inlined_call_operand.vmem [shape: f32[32,8], index: 5, kind: input, shape index: {}]   ;;  %s1052_s6 = inlined_call_operand.hbm [shape: f32[1,8], index: 6, kind: input, shape index: {}]   ;;  %s1053_s7 = inlined_call_operand.vmem [shape: f32[12,8], index: 7, kind: output, shape index: {}]  }
   0x1   :  { %13 = vsyncpa [#allocation5], 0  ;;  %s929_s24 = smov 0  }
   0x2 LB: > { %s882_s25 = smov [#allocation4]   ;;  %s935_s27 = sadd.s32 4294967295, %s880_s24   ;;  %s880_s24 = sphi %s929_s24, %s19_s24  }
   0x3   : > { %s234_s26 = sshll.u32 %s882_s25, 4  ;;  %p672_p0 = scmp.ge.s32.totalorder %s880_s24, 1  ;;  %s235_s26 = int_to_ptr.vmem [resolvable:$true] %s234_s26 }
   0x4   : > { %p202_p1 = scmp.lt.s32.totalorder %s880_s24, 3  ;;  %p1054_p2 = scmp.eq.s32.totalorder %s935_s27, 0 }
   0x5   : > { %s883_s29 = smov [#allocation2]   ;;  %s884_s9 = smov [#allocation6]  }
   0x6   : > { %p940_p3 = pnand %p672_p0, %p202_p1  ;;  %s214_s30 = sshll.u32 %s883_s29, 4  ;;  %s215_s30 = int_to_ptr.vmem [resolvable:$true] %s214_s30 }
   0x7   : > { %s248_s10 = sshll.u32 %s884_s9, 4  ;;  %s799_s11 = scalar_lea.vmem %s235_s26, 16  ;;  %s952_s10 = int_to_ptr.vmem [resolvable:$true] %s248_s10 }
   0x8   : > { %s1056_s28 = scalar_select %p940_p3, 1, 0 }
   0x9   : > { %p747_p4 = pneg %p940_p3  ;;  %p800_p7 = scmp.ne.s32.totalorder %s235_s26, %s799_s11 }
   0xa   : > { %s806_s12 = scalar_lea.vmem %s235_s26, 32  ;;  %p807_p10 = scmp.lt.s32.totalorder %s235_s26, %s235_s26 }
   0xb   : > { %p948_p5 = pnand %p1054_p2, %p747_p4  ;;  %p808_p11 = scmp.lt.s32.totalorder %s806_s12, %s799_s11 }
   0xd   : > { %p790_p6 = pneg %p948_p5  ;;  %p809_p12 = por %p808_p11, %p807_p10 }
   0xf   : > { %p802_p8 = pnand %p800_p7, %p790_p6 }
  0x11   : > { %p803_p9 = pneg %p802_p8 }
  0x13   : > { %p810_p13 = pnand %p809_p12, %p803_p9 }
  0x15   : > { %813 = shalt.err (!%p810_p13)
}
  0x16   : > { %753 = dma.hbm_to_vmem [thread:$0]  (!%p948_p5), %s1050_s4, 16, %s235_s26, [#allocation5]  }
  0x17   : > { %s825_s15 = scalar_lea.vmem %s215_s30, 256  ;;  %p833_p7 = scmp.lt.s32.totalorder %s215_s30, %s215_s30 }
  0x18   : > { %p826_p0 = scmp.ne.s32.totalorder %s215_s30, %s825_s15  ;;  %p834_p8 = scmp.lt.s32.totalorder %s825_s15, %s825_s15 }
  0x1a   : > { %p828_p1 = pnand %p826_p0, %p790_p6  ;;  %p835_p2 = por %p834_p8, %p833_p7 }
  0x1c   : > { %p829_p4 = pneg %p828_p1 }
  0x1e   : > { %p836_p3 = pnand %p835_p2, %p829_p4 }
  0x20   : > { %839 = shalt.err (!%p836_p3)
}
  0x21   : > { %s885_s16 = smov 128   ;;  %s886_s17 = smov 8  }
  0x22   : > { %750 = dma.hbm_to_vmem [thread:$0]  (!%p948_p5), %s1047_s1, 256, %s215_s30, [#allocation3], %s885_s16, %s885_s16, %s886_s17  }
  0x23   : > { %s851_s20 = scalar_lea.vmem %s952_s10, 16  ;;  %s858_s21 = scalar_lea.vmem %s952_s10, 32 }
  0x24   : > { %p852_p9 = scmp.ne.s32.totalorder %s952_s10, %s851_s20  ;;  %p859_p3 = scmp.lt.s32.totalorder %s952_s10, %s952_s10 }
  0x25   : > { %p860_p11 = scmp.lt.s32.totalorder %s858_s21, %s851_s20 }
  0x26   : > { %p854_p10 = pnand %p852_p9, %p790_p6 }
  0x27   : > { %p861_p12 = por %p860_p11, %p859_p3 }
  0x28   : > { %p855_p2 = pneg %p854_p10 }
  0x2a   : > { %p862_p13 = pnand %p861_p12, %p855_p2 }
  0x2c   : > { %865 = shalt.err (!%p862_p13)
}
  0x2d   : > { %756 = dma.hbm_to_vmem [thread:$0]  (!%p948_p5), %s1052_s6, 16, %s952_s10, [#allocation5]  }
  0x2e   : > { %p1058_p0 = scmp.ne.s32.totalorder %s1056_s28, 0 }
  0x2f   : > { %p1059_p6 = scmp.eq.s32.totalorder (!%p1058_p0), %s935_s27, 0 }
  0x30   : > { %268 = sbr.rel (%p1058_p0) target bundleno = 732 (0x2dc), region = 48 }
  0x35   : > { %871 = dma.done.wait (%p1059_p6), [#allocation3], 256   ;;  %p1060_p1 = pmov %p1059_p6 }
  0x37   : > { %873 = vsyncadd (%p1060_p1), [#allocation3], 4294967040  ;;  %p1061_p4 = pmov %p1060_p1 }
  0x38   : > { %p1062_p7 = pmov %p1060_p1 }
  0x39   : > { %875 = dma.done.wait (%p1061_p4), [#allocation5], 32  }
  0x3a   : > { %877 = vsyncadd (%p1062_p7), [#allocation5], 4294967264  ;;  %p306_p8 = scmp.lt.s32.totalorder %s935_s27, 1  ;;  %v887_v0 = vmov 0.0   ;;  %vm888_vm0 = vmmov 0   ;;  %v316_v1 = vld [vmem:[#allocation2 + $0x8] sm:$0xff] }
  0x3b   : > { %706 = vmatprep.subr.mxu0 %v887_v0  ;;  %710 = vmatprep.mubr.msk.f32.mxu0 %vm888_vm0, %v887_v0  ;;  %v315_v2 = vld [vmem:[#allocation2] sm:$0xff]  ;;  %vm324_vm1 = vcmask 130048   ;;  %v409_v4 = vld [vmem:[%s1049_s3 + $0x18] sm:$0xff]  ;;  %v408_v5 = vld [vmem:[%s1049_s3 + $0x10] sm:$0xff]  ;;  %vm417_vm2 = vcmask 261120   ;;  %vm584_vm3 = vcmask 64512  }
  0x3c   : > { %s1064_s27 = smov (!%p306_p8, %s935_s27), 1  ;;  %713 = vmatprep.subr.mxu1 %v887_v0  ;;  %721 = vmatprep.mubr.msk.f32.mxu1 %vm888_vm0, %v887_v0  ;;  %v407_v6 = vld [vmem:[%s1049_s3 + $0x8] sm:$0xff]  ;;  %v406_v7 = vld [vmem:[%s1049_s3] sm:$0xff]  ;;  %v502_v18 = vld [vmem:[%s1051_s5 + $0x18] sm:$0xff] }
  0x3d   : > { %s681_s25 = sshll.u32 %s1064_s27, 3  ;;  %707 = vmatpush3.msra.mxu0 %v316_v1  ;;  %714 = vmatpush3.msra.mxu1 %v409_v4  ;;  %v683_v8 = vld [vmem:[%s1048_s2] ss:$0 sm:$0xff]  ;;  %v501_v19 = vld [vmem:[%s1051_s5 + $0x10] sm:$0xff]  ;;  %v500_v20 = vld [vmem:[%s1051_s5 + $0x8] sm:$0xff] }
  0x3e   : > { %s309_s29 = scalar_lea.vmem %s1046_s0, %s681_s25  ;;  %708 = vmatprep.subr.mxu0 %v887_v0  ;;  %715 = vmatprep.subr.mxu1 %v887_v0  ;;  %v499_v21 = vld [vmem:[%s1051_s5] sm:$0xff]  ;;  %v686_v22 = vld [vmem:[#allocation4] ss:$0 sm:$0xff]  ;;  %v689_v32 = vld [vmem:[#allocation6] ss:$0 sm:$0xff]  ;;  %s313_s30 = scalar_lea.vmem %s1053_s7, %s681_s25 }
  0x3f   : > { %v314_v3 = vld [vmem:[%s309_s29] sm:$0xff]  ;;  %709 = vmatpush3.msra.mxu0 %v315_v2  ;;  %716 = vmatpush3.msra.mxu1 %v408_v5 }
  0x40   : > { %711 = vmatmul.mubr.msk.f32.vlgmr.msra.gmra.mxu0 %vm324_vm1, %v314_v3  ;;  %724 = vmatprep.subr.mxu0 %v887_v0 }
  0x41   : > { %732 = vmatprep.mubr.msk.f32.mxu0 %vm888_vm0, %v887_v0  ;;  %717 = vmatprep.subr.mxu1 %v887_v0 }
  0x42   : > { %718 = vmatpush3.msra.mxu1 %v407_v6  ;;  %725 = vmatpush3.msra.mxu0 %v502_v18 }
  0x43   : > { %719 = vmatprep.subr.mxu1 %v887_v0  ;;  %726 = vmatprep.subr.mxu0 %v887_v0 }
  0x44   : > { %720 = vmatpush3.msra.mxu1 %v406_v7  ;;  %727 = vmatpush3.msra.mxu0 %v501_v19 }
  0x45   : > { %728 = vmatprep.subr.mxu0 %v887_v0 }
  0x46   : > { %729 = vmatpush3.msra.mxu0 %v500_v20 }
  0x47   : > { %730 = vmatprep.subr.mxu0 %v887_v0 }
  0x48   : > { %731 = vmatpush3.msra.mxu0 %v499_v21 }
 0x100   : > { %v394_v9 = vpop.f32.mrf.mxu0 }
 0x101   : > { %v395_v10 = vadd.f32 %v683_v8, %v394_v9 }
 0x102   : > { %v712_v11 = vpop.f32.mrf.mxu0 }
 0x103   : > { %v685_v12 = vmul.f32 -1.442695, %v395_v10  ;;  %v398_v15 = vmul.f32 0.909, %v395_v10 }
 0x105   : > { %778 = vpow2.f32 %v685_v12 }
 0x112   : > { %v779_v13 = vpop.eup %778 }
 0x113   : > { %v402_v14 = vadd.f32 1.0, %v779_v13 }
 0x115   : > { %780 = vrcp.f32 %v402_v14 }
 0x122   : > { %v781_v16 = vpop.eup %780 }
 0x123   : > { %v405_v17 = vmul.f32 %v781_v16, %v398_v15 }
 0x125   : > { %722 = vmatmul.mubr.msk.f32.vlgmr.msra.gmra.mxu1 %vm417_vm2, %v405_v17 }
 0x1e5   : > { %v487_v23 = vpop.f32.mrf.mxu1 }
 0x1e6   : > { %v488_v24 = vadd.f32 %v686_v22, %v487_v23 }
 0x1e7   : > { %v723_v25 = vpop.f32.mrf.mxu1 }
 0x1e8   : > { %v688_v26 = vmul.f32 -1.442695, %v488_v24  ;;  %v491_v29 = vmul.f32 0.909, %v488_v24 }
 0x1ea   : > { %782 = vpow2.f32 %v688_v26 }
 0x1f7   : > { %v783_v27 = vpop.eup %782 }
 0x1f8   : > { %v495_v28 = vadd.f32 1.0, %v783_v27 }
 0x1fa   : > { %784 = vrcp.f32 %v495_v28 }
 0x207   : > { %v785_v30 = vpop.eup %784 }
 0x208   : > { %v498_v31 = vmul.f32 %v785_v30, %v491_v29 }
 0x20a   : > { %733 = vmatmul.mubr.msk.f32.vlgmr.msra.gmra.mxu0 %vm417_vm2, %v498_v31 }
 0x2ca   : > { %v579_v33 = vpop.f32.mrf.mxu0 }
 0x2cb   : > { %v580_v34 = vadd.f32 %v689_v32, %v579_v33 }
 0x2cc   : > { %v734_v35 = vpop.f32.mrf.mxu0 }
 0x2cd   : > { %786 = vtanh.f32 %v580_v34 }
 0x2da   : > { %v787_v36 = vpop.eup %786 }
 0x2db   : > { %585 = vst.msk [vmem:[%s313_s30] sm:$0xff] %vm584_vm3, %v787_v36 }
 0x2dc PF: > { %s19_s24 = sadd.s32 1, %s880_s24  }
 0x2dd   : > { %p16_p5 = scmp.ge.s32.totalorder %s19_s24, 4  }
 0x2df   :  { %18 = sbr.rel (!%p16_p5) target bundleno = 2 (0x2), region = 91 }
 0x2e4   :  { %605 = vsyncpa [#allocation3], 1 }
 0x2e5   :  { %607 = vsyncpa [#allocation3 + $0x1], 1 }
 0x2e6   :  { %608 = vsyncpa [#allocation5], 1 }

</bundles_post_ra>
